<compile_context>
chip_gen: v5e
topology: v5e:2x2
jax: 0.10.0
libtpu: 0.0.40
codegen_flags: <defaults>
</compile_context>

<pallas_src>
import functools
import math

import numpy as np
import jax
import jax.numpy as jnp
from jax.experimental import pallas as pl
from jax.experimental.pallas import tpu as pltpu


_VMEM_TILE_BUDGET = 36 * 1024 * 1024   # conservative working-set budget (fits v7x's 64 MiB)
_VMEM_LIMIT_BYTES = 48 * 1024 * 1024   # explicit scoped-VMEM cap (< physical on v5e/v6e/v7x)


def _round_up(x, m):
    return ((x + m - 1) // m) * m


# ----------------------------------------------------------------------------
# Kernel A: row-tiled dense projection + per-head attention coefficients.
#   h    = feat @ W          (TM, H*F)  -> MXU, stored bf16 for Kernel B
#   attn = h @ S             (TM, 128)  -> MXU, lane-dense f32 store
# S is a block-diagonal selector: columns [0, H) give attn_row, [H, 2H) give
# attn_col, remaining columns are zero (keeps the output 128 lanes wide).
# ----------------------------------------------------------------------------
def _proj_kernel(feat_ref, w_ref, s_ref, h_ref, attn_ref):
    h = jnp.dot(feat_ref[...], w_ref[...], preferred_element_type=jnp.float32)
    hb = h.astype(jnp.bfloat16)
    h_ref[...] = hb
    attn_ref[...] = jnp.dot(hb, s_ref[...], preferred_element_type=jnp.float32)


# ----------------------------------------------------------------------------
# Kernel B: destination-tiled masked edge-softmax + weighted aggregation.
# h_aug packs per head [F features | 1.0] so the softmax denominator rides on
# the same MXU matmul (one extra output column) instead of an XLU row-sum.
# All heads are concatenated into a single lane-dense output store.
# ----------------------------------------------------------------------------
def _agg_kernel(adj_ref, arow_ref, acolt_ref, haug_ref, out_ref,
                *, num_heads, out_feats, negative_slope, out_width):
    faug = out_feats + 1
    tn = adj_ref.shape[0]
    edge = adj_ref[...].astype(jnp.float32) > 0.0          # hoisted: once per tile
    neg_slope = jnp.float32(negative_slope)
    neg_inf = jnp.float32(-1e30)
    outs = []
    for hd in range(num_heads):
        # e[dst, src] = attn_row[dst] + attn_col[src]
        e = arow_ref[:, hd:hd + 1] + acolt_ref[hd:hd + 1, :]      # (TN, N)
        e = jnp.where(e > 0, e, neg_slope * e)                    # LeakyReLU
        e = jnp.where(edge, e, neg_inf)                           # mask non-edges
        m = jnp.max(e, axis=-1, keepdims=True)
        p = jnp.exp(e - m)
        p = jnp.where(edge, p, 0.0)
        # One MXU matmul produces both the weighted sum and the denominator.
        ph = jnp.dot(p.astype(jnp.bfloat16),
                     haug_ref[:, hd * faug:(hd + 1) * faug],
                     preferred_element_type=jnp.float32)          # (TN, F+1)
        denom = ph[:, out_feats:out_feats + 1]
        denom = jnp.where(denom > 0, denom, 1.0)                  # isolated node -> 0 output
        outs.append(ph[:, :out_feats] / denom)
    pad = out_width - num_heads * out_feats
    if pad:
        outs.append(jnp.zeros((tn, pad), jnp.float32))
    out_ref[...] = jnp.concatenate(outs, axis=1)                  # single lane-dense store


# ----------------------------------------------------------------------------
# Glue helpers
# ----------------------------------------------------------------------------
def _csr_to_dense_mask(row_ptr, col_ind, n):
    """Expand CSR (dst -> src neighbors) into a dense int8 0/1 mask [N, N]."""
    num_edges = col_ind.shape[0]
    e_ids = jnp.arange(num_edges, dtype=row_ptr.dtype)
    rows = jnp.searchsorted(row_ptr, e_ids, side="right") - 1
    return jnp.zeros((n, n), jnp.int8).at[rows, col_ind].set(jnp.int8(1))


def _build_selector(attn_l, attn_r, num_heads, out_feats, width=128):
    """Block-diagonal selector S (H*F, 128): h @ S -> [attn_row | attn_col | 0]."""
    hf = num_heads * out_feats
    al = attn_l.reshape(num_heads, out_feats).astype(jnp.float32)
    ar = attn_r.reshape(num_heads, out_feats).astype(jnp.float32)
    rows = jnp.arange(hf)
    head = rows // out_feats
    s = jnp.zeros((hf, width), jnp.float32)
    s = s.at[rows, head].set(al.reshape(hf))
    s = s.at[rows, num_heads + head].set(ar.reshape(hf))
    return s.astype(jnp.bfloat16)


def _pick_row_tile(n, in_feats, hf, max_tile=256):
    """Row tile for Kernel A (multiple of 32), shrunk to fit the VMEM budget."""
    tile = min(max_tile, _round_up(n, 32))
    while tile > 32:
        need = (2 * tile * in_feats * 2                 # feat tile (bf16, double-buffered)
                + 2 * (in_feats * hf * 2 + hf * 128 * 2)  # W + selector (resident)
                + 2 * tile * hf * 2 + 2 * tile * 128 * 4  # h + attn output tiles
                + 2 * tile * max(hf, 128) * 4)            # temporaries
        if need <= _VMEM_TILE_BUDGET:
            break
        tile //= 2
    return tile


def _pick_dst_tile(n_src, num_heads, out_feats, max_tile=256):
    """Destination tile for Kernel B (multiple of 32), shrunk to fit VMEM."""
    hf = num_heads * out_feats
    out_w = _round_up(hf, 128)
    haug_w = num_heads * (out_feats + 1)
    tile = min(max_tile, _round_up(n_src, 32))
    while tile > 32:
        need = (2 * tile * n_src                        # adj tile (int8, double-buffered)
                + 2 * tile * num_heads * 4              # attn_row tile
                + 2 * num_heads * n_src * 4             # attn_col (resident)
                + 2 * n_src * haug_w * 2                # h_aug (resident, bf16)
                + 2 * tile * out_w * 4                  # output tile
                + 3 * tile * n_src * 4)                 # e / p / mask temporaries
        if need <= _VMEM_TILE_BUDGET:
            break
        tile //= 2
    return tile


# ----------------------------------------------------------------------------
# Forward wrapper
# ----------------------------------------------------------------------------
def gat_conv_stash_forward(row_ptr, col_ind, col_ptr, row_ind, feat, permute,
                           W, attn_l, attn_r, negative_slope=0.2):
    del col_ptr, row_ind, permute  # backward-only in the fused "stash" op
    n, in_feats = feat.shape
    num_heads, out_feats = attn_l.shape[1], attn_l.shape[2]
    hf = num_heads * out_feats
    faug = out_feats + 1
    out_w = _round_up(hf, 128)
    assert 2 * num_heads <= 128, "selector packs attn_row/attn_col into 128 lanes"

    feat_b = feat.astype(jnp.bfloat16)
    w_b = W.astype(jnp.bfloat16)
    s_b = _build_selector(attn_l, attn_r, num_heads, out_feats)

    # ---- Kernel A: row-tiled projection + attention coefficients -------------
    tm = _pick_row_tile(n, in_feats, hf)
    n_pad_a = _round_up(n, tm)
    feat_p = jnp.pad(feat_b, ((0, n_pad_a - n), (0, 0)))

    cost_a = pl.CostEstimate(
        flops=int(2 * n_pad_a * in_feats * hf + 2 * n_pad_a * hf * 128),
        transcendentals=0,
        bytes_accessed=int(n_pad_a * in_feats * 2 + in_feats * hf * 2 + hf * 128 * 2
                           + n_pad_a * hf * 2 + n_pad_a * 128 * 4))

    h_b, attn = pl.pallas_call(
        _proj_kernel,
        out_shape=(
            jax.ShapeDtypeStruct((n_pad_a, hf), jnp.bfloat16),
            jax.ShapeDtypeStruct((n_pad_a, 128), jnp.float32),
        ),
        grid=(n_pad_a // tm,),
        in_specs=[
            pl.BlockSpec((tm, in_feats), lambda i: (i, 0)),
            pl.BlockSpec((in_feats, hf), lambda i: (0, 0)),   # W resident
            pl.BlockSpec((hf, 128), lambda i: (0, 0)),        # selector resident
        ],
        out_specs=[
            pl.BlockSpec((tm, hf), lambda i: (i, 0)),
            pl.BlockSpec((tm, 128), lambda i: (i, 0)),
        ],
        compiler_params=pltpu.CompilerParams(
            dimension_semantics=("parallel",),
            vmem_limit_bytes=_VMEM_LIMIT_BYTES),
        cost_estimate=cost_a,
    )(feat_p, w_b, s_b)

    h_b = h_b[:n]
    attn_row = attn[:n, :num_heads]                     # (N, H)
    attn_col_t = attn[:n, num_heads:2 * num_heads].T    # (H, N): no in-kernel transpose

    # h_aug: per head [F features | 1.0] (bf16) so the softmax denominator is
    # just one extra MXU output column in Kernel B.
    h_aug = jnp.concatenate(
        [h_b.reshape(n, num_heads, out_feats),
         jnp.ones((n, num_heads, 1), jnp.bfloat16)],
        axis=-1).reshape(n, num_heads * faug)

    # ---- Kernel B: masked edge-softmax + aggregation --------------------------
    adj = _csr_to_dense_mask(row_ptr, col_ind, n)       # int8 (N, N)
    tn = _pick_dst_tile(n, num_heads, out_feats)
    n_pad_b = _round_up(n, tn)
    adj_p = jnp.pad(adj, ((0, n_pad_b - n), (0, 0)))
    arow_p = jnp.pad(attn_row, ((0, n_pad_b - n), (0, 0)))

    cost_b = pl.CostEstimate(
        flops=int(2 * num_heads * n_pad_b * n * faug + 8 * num_heads * n_pad_b * n),
        transcendentals=int(num_heads * n_pad_b * n),
        bytes_accessed=int(n_pad_b * n + n_pad_b * num_heads * 4 + num_heads * n * 4
                           + n * num_heads * faug * 2 + n_pad_b * out_w * 4))

    out = pl.pallas_call(
        functools.partial(_agg_kernel, num_heads=num_heads, out_feats=out_feats,
                          negative_slope=negative_slope, out_width=out_w),
        out_shape=jax.ShapeDtypeStruct((n_pad_b, out_w), jnp.float32),
        grid=(n_pad_b // tn,),
        in_specs=[
            pl.BlockSpec((tn, n), lambda i: (i, 0)),                 # adjacency tile (int8)
            pl.BlockSpec((tn, num_heads), lambda i: (i, 0)),         # attn_row tile
            pl.BlockSpec((num_heads, n), lambda i: (0, 0)),          # attn_col (resident)
            pl.BlockSpec((n, num_heads * faug), lambda i: (0, 0)),   # h_aug (resident)
        ],
        out_specs=pl.BlockSpec((tn, out_w), lambda i: (i, 0)),
        compiler_params=pltpu.CompilerParams(
            dimension_semantics=("parallel",),
            vmem_limit_bytes=_VMEM_LIMIT_BYTES),
        cost_estimate=cost_b,
    )(adj_p, arow_p, attn_col_t, h_aug)

    return out[:n, :hf].reshape(n, num_heads, out_feats)


# ----------------------------------------------------------------------------
# Pure-JAX reference (same semantics) for a correctness check.  It mirrors the
# kernel's bf16 rounding of feat/W/attn parameters (the intentional MXU
# mixed-precision choice) but otherwise runs in f32.
# ----------------------------------------------------------------------------
def _reference(row_ptr, col_ind, feat, W, attn_l, attn_r, negative_slope):
    n = feat.shape[0]
    num_heads, out_feats = attn_l.shape[1], attn_l.shape[2]
    f32 = jnp.float32
    featb = feat.astype(jnp.bfloat16).astype(f32)
    Wb = W.astype(jnp.bfloat16).astype(f32)
    alb = attn_l.astype(jnp.bfloat16).astype(f32)
    arb = attn_r.astype(jnp.bfloat16).astype(f32)
    h = (featb @ Wb).reshape(n, num_heads, out_feats)
    attn_row = jnp.sum(alb * h, axis=-1)   # (N, H)
    attn_col = jnp.sum(arb * h, axis=-1)   # (N, H)
    adj = _csr_to_dense_mask(row_ptr, col_ind, n).astype(f32)
    e = attn_row[:, None, :] + attn_col[None, :, :]               # (N, N, H)
    e = jnp.where(e > 0, e, negative_slope * e)
    e = jnp.where(adj[:, :, None] > 0, e, -1e30)
    m = jnp.max(e, axis=1, keepdims=True)
    p = jnp.exp(e - m)
    p = jnp.where(adj[:, :, None] > 0, p, 0.0)
    denom = jnp.sum(p, axis=1, keepdims=True)
    denom = jnp.where(denom > 0, denom, 1.0)
    alpha = p / denom                                             # (N, N, H)
    out = jnp.einsum("dsh,shf->dhf", alpha, h)
    return out


if __name__ == "__main__":
    # Small shapes consistent with the module.
    N, in_feats, out_feats, num_heads = 16, 8, 8, 4
    negative_slope = 0.2

    key = jax.random.PRNGKey(0)
    k_feat, k_adj, k_w, k_l, k_r = jax.random.split(key, 5)

    feat = jax.random.normal(k_feat, (N, in_feats), dtype=jnp.float32)

    # Deterministic random graph (with self-loops) -> CSR / CSC / permute.
    A = np.array(jax.random.uniform(k_adj, (N, N)) < 0.3, dtype=np.float32)
    np.fill_diagonal(A, 1.0)
    row_ptr = np.zeros(N + 1, np.int32)
    col_ind = []
    for i in range(N):
        nbrs = np.nonzero(A[i])[0]
        col_ind.extend(nbrs.tolist())
        row_ptr[i + 1] = len(col_ind)
    col_ind = np.array(col_ind, np.int32)
    # CSC + permutation (unused in forward, passed for interface parity).
    col_ptr = np.zeros(N + 1, np.int32)
    row_ind = []
    for j in range(N):
        nbrs = np.nonzero(A[:, j])[0]
        row_ind.extend(nbrs.tolist())
        col_ptr[j + 1] = len(row_ind)
    row_ind = np.array(row_ind, np.int32)
    permute = np.arange(col_ind.shape[0], dtype=np.int32)

    # Parameter init matching xavier_normal_ with gain=calculate_gain('relu')=sqrt(2).
    gain = math.sqrt(2.0)
    std_w = gain * math.sqrt(2.0 / (in_feats + out_feats * num_heads))
    W = std_w * jax.random.normal(k_w, (in_feats, out_feats * num_heads), dtype=jnp.float32)
    std_a = gain * math.sqrt(2.0 / (num_heads * out_feats + out_feats))
    attn_l = std_a * jax.random.normal(k_l, (1, num_heads, out_feats), dtype=jnp.float32)
    attn_r = std_a * jax.random.normal(k_r, (1, num_heads, out_feats), dtype=jnp.float32)

    row_ptr_j = jnp.asarray(row_ptr)
    col_ind_j = jnp.asarray(col_ind)

    out = gat_conv_stash_forward(row_ptr_j, col_ind_j, jnp.asarray(col_ptr),
                                 jnp.asarray(row_ind), feat, jnp.asarray(permute),
                                 W, attn_l, attn_r, negative_slope)
    out = jax.block_until_ready(out)

    ref = _reference(row_ptr_j, col_ind_j, feat, W, attn_l, attn_r, negative_slope)
    ref = jax.block_until_ready(ref)

    assert out.shape == (N, num_heads, out_feats)
    # bf16 MXU operands (h, p, parameters) vs. the mostly-f32 reference.
    np.testing.assert_allclose(np.asarray(out), np.asarray(ref), rtol=3e-2, atol=3e-2)
    print("KERNEL_OK")
</pallas_src>

<mosaic_0001>
module attributes {stable_mosaic.version = 11 : i64} {
  func.func @_proj_kernel(%arg0: i32, %arg1: memref<32x8xbf16, #tpu.memory_space<vmem>>, %arg2: memref<8x32xbf16, #tpu.memory_space<vmem>>, %arg3: memref<32x128xbf16, #tpu.memory_space<vmem>>, %arg4: memref<32x32xbf16, #tpu.memory_space<vmem>>, %arg5: memref<32x128xf32, #tpu.memory_space<vmem>>) attributes {dimension_semantics = [#tpu.dimension_semantics<parallel>], iteration_bounds = array<i64: 1>, scalar_prefetch = 0 : i64, scratch_operands = 0 : i64, tpu.core_type = #tpu.core_type<tc>, window_params = [{transform_indices = @transform_0, window_bounds = array<i64: 32, 8>}, {pipeline_mode = #tpu.pipeline_mode<synchronous>, transform_indices = @transform_1, window_bounds = array<i64: 8, 32>}, {pipeline_mode = #tpu.pipeline_mode<synchronous>, transform_indices = @transform_2, window_bounds = array<i64: 32, 128>}, {transform_indices = @transform_3, window_bounds = array<i64: 32, 32>}, {transform_indices = @transform_4, window_bounds = array<i64: 32, 128>}]} {
    %c0 = arith.constant 0 : index
    %c0_0 = arith.constant 0 : index
    %0 = vector.load %arg1[%c0, %c0_0] : memref<32x8xbf16, #tpu.memory_space<vmem>>, vector<32x8xbf16>
    %c0_1 = arith.constant 0 : index
    %c0_2 = arith.constant 0 : index
    %1 = vector.load %arg2[%c0_1, %c0_2] : memref<8x32xbf16, #tpu.memory_space<vmem>>, vector<8x32xbf16>
    %cst = arith.constant dense<0.000000e+00> : vector<32x32xf32>
    %2 = tpu.matmul %0, %1, %cst {dimension_numbers = #tpu.dot_dimension_numbers<[1], [0], [0], [1], [0, 0, 1, 1], [], []>} : vector<32x8xbf16>, vector<8x32xbf16>, vector<32x32xf32> -> vector<32x32xf32>
    %3 = arith.truncf %2 : vector<32x32xf32> to vector<32x32xbf16>
    %c0_3 = arith.constant 0 : index
    %c0_4 = arith.constant 0 : index
    %4 = vector.load %arg4[%c0_3, %c0_4] : memref<32x32xbf16, #tpu.memory_space<vmem>>, vector<32x32xbf16>
    tpu.vector_store %arg4[%c0_3, %c0_4], %3 {strides = array<i32>} : memref<32x32xbf16, #tpu.memory_space<vmem>>, vector<32x32xbf16>,
    %c0_5 = arith.constant 0 : index
    %c0_6 = arith.constant 0 : index
    %5 = vector.load %arg3[%c0_5, %c0_6] : memref<32x128xbf16, #tpu.memory_space<vmem>>, vector<32x128xbf16>
    %cst_7 = arith.constant dense<0.000000e+00> : vector<32x128xf32>
    %6 = tpu.matmul %3, %5, %cst_7 {dimension_numbers = #tpu.dot_dimension_numbers<[1], [0], [0], [1], [0, 0, 1, 1], [], []>} : vector<32x32xbf16>, vector<32x128xbf16>, vector<32x128xf32> -> vector<32x128xf32>
    %c0_8 = arith.constant 0 : index
    %c0_9 = arith.constant 0 : index
    %7 = vector.load %arg5[%c0_8, %c0_9] : memref<32x128xf32, #tpu.memory_space<vmem>>, vector<32x128xf32>
    tpu.vector_store %arg5[%c0_8, %c0_9], %6 {strides = array<i32>} : memref<32x128xf32, #tpu.memory_space<vmem>>, vector<32x128xf32>,
    return
  }
  func.func @transform_0(%arg0: i32) -> (i32, i32) {
    %c0_i32 = arith.constant 0 : i32
    %c0_i32_0 = arith.constant 0 : i32
    return %arg0, %c0_i32 : i32, i32
  }
  func.func @transform_1(%arg0: i32) -> (i32, i32) {
    %c0_i32 = arith.constant 0 : i32
    %c0_i32_0 = arith.constant 0 : i32
    %c0_i32_1 = arith.constant 0 : i32
    return %c0_i32, %c0_i32_0 : i32, i32
  }
  func.func @transform_2(%arg0: i32) -> (i32, i32) {
    %c0_i32 = arith.constant 0 : i32
    %c0_i32_0 = arith.constant 0 : i32
    %c0_i32_1 = arith.constant 0 : i32
    return %c0_i32, %c0_i32_0 : i32, i32
  }
  func.func @transform_3(%arg0: i32) -> (i32, i32) {
    %c0_i32 = arith.constant 0 : i32
    %c0_i32_0 = arith.constant 0 : i32
    return %arg0, %c0_i32 : i32, i32
  }
  func.func @transform_4(%arg0: i32) -> (i32, i32) {
    %c0_i32 = arith.constant 0 : i32
    %c0_i32_0 = arith.constant 0 : i32
    return %arg0, %c0_i32 : i32, i32
  }
}

</mosaic_0001>

<bundles_post_ra>
// kernel: tpu_custom_call.1
= control target key start
LH: loop header
LB: loop body
LE: loop exit
PB: predicated region body
PF: predicated region fallthrough
CT: control target
= control target key end

     0   :  { %10 = vsyncpa [#allocation3], 0  ;;  %vm41_vm0 = vcmask 1043456   ;;  %s306_s0 = inlined_call_operand.vmem [shape: bf16[32,8], index: 0, kind: input, shape index: {}]   ;;  %s307_s1 = inlined_call_operand.vmem [shape: bf16[8,32], index: 1, kind: input, shape index: {}]   ;;  %s308_s2 = inlined_call_operand.vmem [shape: bf16[32,128], index: 2, kind: input, shape index: {}]   ;;  %s309_s3 = inlined_call_operand.hbm [shape: bf16[32,32], index: 3, kind: output, shape index: {0}]   ;;  %s310_s4 = inlined_call_operand.hbm [shape: f32[32,128], index: 4, kind: output, shape index: {1}]  }
   0x1   :  { %v23_v0 = vld [vmem:[%s307_s1] sm:$0xf]  ;;  %v186_v3 = vld [vmem:[%s306_s0 + $0x8] sm:$0xff] }
   0x2   :  { %v43_v1 = vsel %vm41_vm0, %v23_v0, 0  ;;  %v185_v2 = vld [vmem:[%s306_s0] sm:$0xff] }
   0x3   :  { %11 = vsyncpa [#allocation5], 0  ;;  %52 = vmatpush.bf16.msra.mxu0 %v43_v1  ;;  %189 = vmatpush.bf16.msra.mxu3 %v43_v1  ;;  %vm34_vm1 = vcmask 64512   ;;  %v188_v4 = vld [vmem:[%s308_s2 + $0x8] sm:$0xff]  ;;  %v187_v5 = vld [vmem:[%s308_s2] sm:$0xff]  ;;  %vm68_vm2 = vcmask 257024  }
   0x4   :  { %112 = vmatpush.bf16.msra.mxu1 %v188_v4  ;;  %190 = vmatpush.bf16.msra.mxu2 %v188_v4  ;;  %vm99_vm3 = vcmask 261120   ;;  %s250_s0 = smov [#allocation2]   ;;  %s135_s26 = sshll.u32 %s309_s3, 4  ;;  %s136_s26 = int_to_ptr.hbm [resolvable:$true] %s135_s26 }
   0x5   :  { %s133_s2 = sshll.u32 %s250_s0, 4  ;;  %s251_s27 = smov 64   ;;  %s134_s2 = int_to_ptr.vmem [resolvable:$true] %s133_s2 }
   0x6   :  { %173 = vmatmul.msk.bf16.vlgmr.msra.gmra.mxu0 %vm34_vm1, %v185_v2  ;;  %174 = vmatmul.msk.bf16.vlgmr.msra.gmra.mxu3 %vm34_vm1, %v186_v3  ;;  %s252_s28 = smov 4   ;;  %s253_s29 = smov [#allocation4]  }
   0x7   :  { %s146_s30 = sshll.u32 %s253_s29, 4  ;;  %s148_s7 = sshll.u32 %s310_s4, 4  ;;  %s147_s30 = int_to_ptr.vmem [resolvable:$true] %s146_s30  ;;  %s149_s7 = int_to_ptr.hbm [resolvable:$true] %s148_s7 }
   0x8   :  { %113 = vmatpush.bf16.msra.mxu1 %v187_v5  ;;  %191 = vmatpush.bf16.msra.mxu2 %v187_v5  ;;  %s254_s3 = smov 128   ;;  %s255_s8 = smov 8  }
  0x83   :  { %v54_v6 = vpop.f32.mrf.mxu0 }
  0x84   :  { %v64_v7 = vpack.c.bf16 %v54_v6, %v54_v6 }
  0x86   :  { %69 = vst.msk [vmem:[#allocation2] sm:$0xf] %vm68_vm2, %v64_v7  ;;  %v81_v11 = vunpack.c.l.b16 %v64_v7 }
  0x89   :  { %v59_v8 = vpop.f32.mrf.mxu3 }
  0x8a   :  { %v66_v9 = vpack.c.bf16 %v59_v8, %v59_v8 }
  0x8b   :  { %v56_v10 = vpop.f32.mrf.mxu0 }
  0x8c   :  { %71 = vst.msk [vmem:[#allocation2 + $0x8] sm:$0xf] %vm68_vm2, %v66_v9  ;;  %v65_v12 = vpack.c.bf16 %v56_v10, %v56_v10  ;;  %v83_v17 = vunpack.c.l.b16 %v66_v9 }
  0x8e   :  { %70 = vst.msk [vmem:[#allocation2 + $0x4] sm:$0xf] %vm68_vm2, %v65_v12  ;;  %v82_v13 = vunpack.c.l.b16 %v65_v12 }
  0x90   :  { %v85_v14 = vpack.c.b16 %v82_v13, %v81_v11 }
  0x91   :  { %v61_v15 = vpop.f32.mrf.mxu3 }
  0x92   :  { %v67_v16 = vpack.c.bf16 %v61_v15, %v61_v15  ;;  %183 = vmatmul.msk.bf16.vlgmr.msra.gmra.mxu1 %vm99_vm3, %v85_v14 }
  0x94   :  { %72 = vst.msk [vmem:[#allocation2 + $0xc] sm:$0xf] %vm68_vm2, %v67_v16  ;;  %v84_v18 = vunpack.c.l.b16 %v67_v16 }
  0x95   :  { %141 = dma.vmem_to_hbm [thread:$0]  %s134_s2, 256, %s136_s26, [#allocation3], %s251_s27, %s251_s27, %s252_s28  }
  0x96   :  { %v86_v19 = vpack.c.b16 %v84_v18, %v83_v17 }
  0x98   :  { %184 = vmatmul.msk.bf16.vlgmr.msra.gmra.mxu2 %vm99_vm3, %v86_v19 }
 0x10f   :  { %v115_v20 = vpop.f32.mrf.mxu1 }
 0x110   :  { %125 = vst [vmem:[#allocation4] sm:$0xff] %v115_v20 }
 0x117   :  { %v117_v21 = vpop.f32.mrf.mxu1 }
 0x118   :  { %126 = vst [vmem:[#allocation4 + $0x8] sm:$0xff] %v117_v21 }
 0x11b   :  { %v120_v22 = vpop.f32.mrf.mxu2 }
 0x11c   :  { %127 = vst [vmem:[#allocation4 + $0x10] sm:$0xff] %v120_v22 }
 0x123   :  { %v122_v23 = vpop.f32.mrf.mxu2 }
 0x124   :  { %128 = vst [vmem:[#allocation4 + $0x18] sm:$0xff] %v122_v23 }
 0x125   :  { %154 = dma.vmem_to_hbm [thread:$0]  %s147_s30, 512, %s149_s7, [#allocation5], %s254_s3, %s254_s3, %s255_s8  }
 0x126   :  { %246 = dma.done.wait [#allocation3], 256  }
 0x127   :  { %247 = vsyncadd [#allocation3], 4294967040 }
 0x128   :  { %248 = dma.done.wait [#allocation5], 512  }
 0x129   :  { %249 = vsyncadd [#allocation5], 4294966784 }
 0x12a   :  { %163 = vsyncpa [#allocation3], 1 }
 0x12b   :  { %164 = vsyncpa [#allocation5], 1 }

</bundles_post_ra>
